<compile_context>
chip_gen: v6e
topology: v6e:2x2x1
jax: 0.10.0
libtpu: 0.0.40
codegen_flags: <defaults>
</compile_context>

<pallas_src>
import jax
import jax.numpy as jnp
from jax.experimental import pallas as pl
from jax.experimental.pallas import tpu as pltpu


def _round_up(x, m):
    return ((x + m - 1) // m) * m


def _bspec(shape, index_map, n_buf=None):
    """BlockSpec helper; only passes pipeline_mode when explicitly requested."""
    if n_buf is None:
        return pl.BlockSpec(shape, index_map)
    return pl.BlockSpec(shape, index_map, pipeline_mode=pl.Buffered(n_buf))


# ---------------------------------------------------------------------------
# Kernels
# ---------------------------------------------------------------------------
def _fused_kernel(x_ref, w1_ref, b1_ref, w2_ref, b2_ref, o_ref):
    """Fast path: whole contraction in one step (w1 resident in VMEM).

    grid = (batch tiles,). encoder matmul -> bias -> ReLU -> classifier
    matmul -> bias -> store, all per batch tile.
    """
    z = jnp.dot(x_ref[...], w1_ref[...], preferred_element_type=jnp.float32)
    z = jnp.maximum(z + b1_ref[...], 0.0)                    # f32 bias + ReLU
    y = jnp.dot(z.astype(w2_ref.dtype), w2_ref[...],          # bf16 classifier
                preferred_element_type=jnp.float32)
    o_ref[...] = (y + b2_ref[...]).astype(o_ref.dtype)


def _ktiled_kernel(x_ref, w1_ref, b1_ref, w2_ref, b2_ref, o_ref, acc_ref):
    """Fallback for large D*HID: accumulate encoder matmul over K tiles.

    grid = (batch tiles, K tiles); K is the trailing "arbitrary" axis with an
    f32 VMEM accumulator; bias/ReLU/classifier/store only on the last K step.
    """
    k = pl.program_id(1)

    @pl.when(k == 0)
    def _():
        acc_ref[...] = jnp.zeros_like(acc_ref)

    acc_ref[...] += jnp.dot(x_ref[...], w1_ref[...],
                            preferred_element_type=jnp.float32)

    @pl.when(k == pl.num_programs(1) - 1)
    def _():
        z = jnp.maximum(acc_ref[...] + b1_ref[...], 0.0)
        y = jnp.dot(z.astype(w2_ref.dtype), w2_ref[...],
                    preferred_element_type=jnp.float32)
        o_ref[...] = (y + b2_ref[...]).astype(o_ref.dtype)


# ---------------------------------------------------------------------------
# Wrapper
# ---------------------------------------------------------------------------
_VMEM_BUDGET = 40 << 20         # conservative working-set budget (v7x TC: 64 MiB)
_VMEM_LIMIT_CAP = 48 << 20      # never request more scoped VMEM than this
_RESIDENT_W1_BUDGET = 12 << 20  # keep w1 fully resident (drop K axis) below this


def make_enclassifier(w1, b1, w2, b2, *, tile_b=256, force_ktiled=False):
    """Casts + pads the parameters ONCE (off the per-call hot path) and returns
    a callable:  x_nchw [B,C,H,W] f32  ->  logits [B, NC] f32.

    w1:[D,HID], b1:[HID], w2:[HID,NC], b2:[NC] (weights pre-transposed to
    [in_features, out_features])."""
    D, HID = w1.shape
    NC = w2.shape[1]
    hid_pad = _round_up(HID, 128)
    nc_pad = _round_up(NC, 128)

    fused = (not force_ktiled) and \
        (_round_up(D, 128) * hid_pad * 2 <= _RESIDENT_W1_BUDGET)

    if fused:
        d_pad = _round_up(D, 128)
        tile_k = d_pad
    else:
        tile_k = min(512, _round_up(D, 256))
        d_pad = _round_up(D, tile_k)

    # ---- one-time parameter cast + pad (lane-dense, (8,128)-aligned) -------
    w1_p = jnp.zeros((d_pad, hid_pad), jnp.bfloat16).at[:D, :HID].set(
        w1.astype(jnp.bfloat16))
    b1_p = jnp.zeros((1, hid_pad), jnp.float32).at[:, :HID].set(
        b1.reshape(1, HID).astype(jnp.float32))
    w2_p = jnp.zeros((hid_pad, nc_pad), jnp.bfloat16).at[:HID, :NC].set(
        w2.astype(jnp.bfloat16))
    b2_p = jnp.zeros((1, nc_pad), jnp.float32).at[:, :NC].set(
        b2.reshape(1, NC).astype(jnp.float32))

    def forward(x_nchw):
        B = x_nchw.shape[0]

        # ---- batch tile plan (bf16 packs 16 rows per sublane pair) ---------
        b_round = _round_up(B, 16)
        tb = min(tile_b, b_round)

        if fused:
            def need(tb_):
                return (2 * tb_ * d_pad * 2           # x tile (double buffered)
                        + d_pad * hid_pad * 2         # w1 resident (1 buffer)
                        + hid_pad * nc_pad * 2        # w2 resident
                        + (hid_pad + nc_pad) * 4      # biases
                        + tb_ * hid_pad * 4           # z intermediate
                        + 2 * tb_ * nc_pad * 4)       # out tile (double buffered)
            while need(tb) > _VMEM_BUDGET and tb > 16:
                tb = max(16, _round_up(tb // 2, 16))
            # Give the second TensorCore (v7x megacore) work when possible.
            if b_round // tb == 1 and b_round >= 32:
                tb = _round_up(b_round // 2, 16)
            b_pad = _round_up(B, tb)
            vmem_req = need(tb)
        else:
            tk = tile_k

            def need(tb_, tk_):
                nbuf = 3 if d_pad // tk_ >= 3 else 2
                return (nbuf * tb_ * tk_ * 2          # x tiles
                        + nbuf * tk_ * hid_pad * 2    # w1 tiles
                        + hid_pad * nc_pad * 2        # w2 resident
                        + (hid_pad + nc_pad) * 4      # biases
                        + tb_ * hid_pad * 4           # f32 accumulator
                        + 2 * tb_ * nc_pad * 4)       # out tile
            # TODO(synk): for HID in the many-thousands range an explicit HID
            # (N) grid axis would beat only shrinking tb/tk here.
            while need(tb, tk) > _VMEM_BUDGET and tk > 256 and d_pad % (tk // 2) == 0:
                tk //= 2
            while need(tb, tk) > _VMEM_BUDGET and tb > 16:
                tb = max(16, _round_up(tb // 2, 16))
            if b_round // tb == 1 and b_round >= 32:
                tb = _round_up(b_round // 2, 16)
            b_pad = _round_up(B, tb)
            vmem_req = need(tb, tk)

        vmem_limit = min(_VMEM_LIMIT_CAP, max(vmem_req + (8 << 20), 32 << 20))

        # ---- activation prep: flatten; pad only if actually ragged ---------
        x2d = x_nchw.reshape(B, -1).astype(jnp.bfloat16)   # == torch.flatten(x, 1)
        if b_pad != B or d_pad != D:
            x_p = jnp.pad(x2d, ((0, b_pad - B), (0, d_pad - D)))
        else:
            x_p = x2d

        if fused:
            out_p = pl.pallas_call(
                _fused_kernel,
                out_shape=jax.ShapeDtypeStruct((b_pad, nc_pad), jnp.float32),
                grid_spec=pltpu.PrefetchScalarGridSpec(
                    num_scalar_prefetch=0,
                    grid=(b_pad // tb,),
                    in_specs=[
                        pl.BlockSpec((tb, d_pad), lambda i: (i, 0)),        # x
                        _bspec((d_pad, hid_pad), lambda i: (0, 0), 1),      # w1
                        _bspec((1, hid_pad), lambda i: (0, 0), 1),          # b1
                        _bspec((hid_pad, nc_pad), lambda i: (0, 0), 1),     # w2
                        _bspec((1, nc_pad), lambda i: (0, 0), 1),           # b2
                    ],
                    out_specs=pl.BlockSpec((tb, nc_pad), lambda i: (i, 0)),
                ),
                compiler_params=pltpu.CompilerParams(
                    dimension_semantics=("parallel",),
                    vmem_limit_bytes=vmem_limit,
                ),
            )(x_p, w1_p, b1_p, w2_p, b2_p)
        else:
            n_k = d_pad // tk
            nbuf_xw = 3 if n_k >= 3 else None   # hide last-K epilogue bubble
            out_p = pl.pallas_call(
                _ktiled_kernel,
                out_shape=jax.ShapeDtypeStruct((b_pad, nc_pad), jnp.float32),
                grid_spec=pltpu.PrefetchScalarGridSpec(
                    num_scalar_prefetch=0,
                    grid=(b_pad // tb, n_k),
                    in_specs=[
                        _bspec((tb, tk), lambda i, k: (i, k), nbuf_xw),      # x
                        _bspec((tk, hid_pad), lambda i, k: (k, 0), nbuf_xw),  # w1
                        _bspec((1, hid_pad), lambda i, k: (0, 0), 1),        # b1
                        _bspec((hid_pad, nc_pad), lambda i, k: (0, 0), 1),   # w2
                        _bspec((1, nc_pad), lambda i, k: (0, 0), 1),         # b2
                    ],
                    out_specs=pl.BlockSpec((tb, nc_pad), lambda i, k: (i, 0)),
                    scratch_shapes=[pltpu.VMEM((tb, hid_pad), jnp.float32)],
                ),
                compiler_params=pltpu.CompilerParams(
                    dimension_semantics=("parallel", "arbitrary"),
                    vmem_limit_bytes=vmem_limit,
                ),
            )(x_p, w1_p, b1_p, w2_p, b2_p)

        return out_p[:B, :NC]

    return forward


# ---------------------------------------------------------------------------
# Reference + init
# ---------------------------------------------------------------------------
def _init_params(key, d_in, hid, n_classes):
    """PyTorch-style Linear init: U(-1/sqrt(fan_in), 1/sqrt(fan_in)).
    Weights stored pre-transposed as [in_features, out_features]."""
    k1, k2, k3, k4 = jax.random.split(key, 4)
    s1 = 1.0 / jnp.sqrt(d_in)
    s2 = 1.0 / jnp.sqrt(hid)
    w1 = jax.random.uniform(k1, (d_in, hid), jnp.float32, -s1, s1)
    b1 = jax.random.uniform(k2, (hid,), jnp.float32, -s1, s1)
    w2 = jax.random.uniform(k3, (hid, n_classes), jnp.float32, -s2, s2)
    b2 = jax.random.uniform(k4, (n_classes,), jnp.float32, -s2, s2)
    return w1, b1, w2, b2


def _reference(x_nchw, w1, b1, w2, b2):
    """Pure-JAX reference with the same bf16-operand / f32-accumulate plan."""
    B = x_nchw.shape[0]
    x2d = x_nchw.reshape(B, -1)
    z = jnp.dot(x2d.astype(jnp.bfloat16), w1.astype(jnp.bfloat16),
                preferred_element_type=jnp.float32) + b1
    z = jnp.maximum(z, 0.0)
    y = jnp.dot(z.astype(jnp.bfloat16), w2.astype(jnp.bfloat16),
                preferred_element_type=jnp.float32) + b2
    return y


if __name__ == "__main__":
    B, C, H, W = 2, 4, 16, 16
    HID, NUM_CLASSES = 32, 10
    D = C * H * W

    key = jax.random.PRNGKey(0)
    kx, kp = jax.random.split(key)
    x = jax.random.normal(kx, (B, C, H, W), jnp.float32)
    w1, b1, w2, b2 = _init_params(kp, D, HID, NUM_CLASSES)

    ref = _reference(x, w1, b1, w2, b2)

    # Fast path: w1 fully resident, 1-D grid over batch only.
    fwd = make_enclassifier(w1, b1, w2, b2)
    out = jax.block_until_ready(fwd(x))
    assert out.shape == (B, NUM_CLASSES)
    assert jnp.allclose(out, ref, atol=1e-2, rtol=1e-2), "fused path mismatch"

    # Large-model fallback (K-tiled accumulator) exercised at small shapes too.
    fwd_k = make_enclassifier(w1, b1, w2, b2, force_ktiled=True)
    out_k = jax.block_until_ready(fwd_k(x))
    assert out_k.shape == (B, NUM_CLASSES)
    assert jnp.allclose(out_k, ref, atol=1e-2, rtol=1e-2), "k-tiled path mismatch"

    print("KERNEL_OK")
</pallas_src>

<mosaic_0001>
module attributes {stable_mosaic.version = 11 : i64} {
  func.func @_fused_kernel(%arg0: i32, %arg1: memref<16x1024xbf16, #tpu.memory_space<vmem>>, %arg2: memref<1024x128xbf16, #tpu.memory_space<vmem>>, %arg3: memref<1x128xf32, #tpu.memory_space<vmem>>, %arg4: memref<128x128xbf16, #tpu.memory_space<vmem>>, %arg5: memref<1x128xf32, #tpu.memory_space<vmem>>, %arg6: memref<16x128xf32, #tpu.memory_space<vmem>>) attributes {dimension_semantics = [#tpu.dimension_semantics<parallel>], iteration_bounds = array<i64: 1>, scalar_prefetch = 0 : i64, scratch_operands = 0 : i64, tpu.core_type = #tpu.core_type<tc>, window_params = [{transform_indices = @transform_0, window_bounds = array<i64: 16, 1024>}, {pipeline_mode = #tpu.pipeline_mode<synchronous>, transform_indices = @transform_1, window_bounds = array<i64: 1024, 128>}, {pipeline_mode = #tpu.pipeline_mode<synchronous>, transform_indices = @transform_2, window_bounds = array<i64: 1, 128>}, {pipeline_mode = #tpu.pipeline_mode<synchronous>, transform_indices = @transform_3, window_bounds = array<i64: 128, 128>}, {pipeline_mode = #tpu.pipeline_mode<synchronous>, transform_indices = @transform_4, window_bounds = array<i64: 1, 128>}, {transform_indices = @transform_5, window_bounds = array<i64: 16, 128>}]} {
    %c0 = arith.constant 0 : index
    %c0_0 = arith.constant 0 : index
    %0 = vector.load %arg1[%c0, %c0_0] : memref<16x1024xbf16, #tpu.memory_space<vmem>>, vector<16x1024xbf16>
    %c0_1 = arith.constant 0 : index
    %c0_2 = arith.constant 0 : index
    %1 = vector.load %arg2[%c0_1, %c0_2] : memref<1024x128xbf16, #tpu.memory_space<vmem>>, vector<1024x128xbf16>
    %cst = arith.constant dense<0.000000e+00> : vector<16x128xf32>
    %2 = tpu.matmul %0, %1, %cst {dimension_numbers = #tpu.dot_dimension_numbers<[1], [0], [0], [1], [0, 0, 1, 1], [], []>} : vector<16x1024xbf16>, vector<1024x128xbf16>, vector<16x128xf32> -> vector<16x128xf32>
    %c0_3 = arith.constant 0 : index
    %c0_4 = arith.constant 0 : index
    %3 = vector.load %arg3[%c0_3, %c0_4] : memref<1x128xf32, #tpu.memory_space<vmem>>, vector<1x128xf32>
    %4 = vector.broadcast %3 : vector<1x128xf32> to vector<16x128xf32>
    %5 = arith.addf %2, %4 : vector<16x128xf32>
    %cst_5 = arith.constant 0.000000e+00 : f32
    %6 = vector.broadcast %cst_5 : f32 to vector<16x128xf32>
    %7 = arith.maximumf %5, %6 : vector<16x128xf32>
    %8 = arith.truncf %7 : vector<16x128xf32> to vector<16x128xbf16>
    %c0_6 = arith.constant 0 : index
    %c0_7 = arith.constant 0 : index
    %9 = vector.load %arg4[%c0_6, %c0_7] : memref<128x128xbf16, #tpu.memory_space<vmem>>, vector<128x128xbf16>
    %cst_8 = arith.constant dense<0.000000e+00> : vector<16x128xf32>
    %10 = tpu.matmul %8, %9, %cst_8 {dimension_numbers = #tpu.dot_dimension_numbers<[1], [0], [0], [1], [0, 0, 1, 1], [], []>} : vector<16x128xbf16>, vector<128x128xbf16>, vector<16x128xf32> -> vector<16x128xf32>
    %c0_9 = arith.constant 0 : index
    %c0_10 = arith.constant 0 : index
    %11 = vector.load %arg5[%c0_9, %c0_10] : memref<1x128xf32, #tpu.memory_space<vmem>>, vector<1x128xf32>
    %12 = vector.broadcast %11 : vector<1x128xf32> to vector<16x128xf32>
    %13 = arith.addf %10, %12 : vector<16x128xf32>
    %c0_11 = arith.constant 0 : index
    %c0_12 = arith.constant 0 : index
    %14 = vector.load %arg6[%c0_11, %c0_12] : memref<16x128xf32, #tpu.memory_space<vmem>>, vector<16x128xf32>
    tpu.vector_store %arg6[%c0_11, %c0_12], %13 {strides = array<i32>} : memref<16x128xf32, #tpu.memory_space<vmem>>, vector<16x128xf32>,
    return
  }
  func.func @transform_0(%arg0: i32) -> (i32, i32) {
    %c0_i32 = arith.constant 0 : i32
    %c0_i32_0 = arith.constant 0 : i32
    return %arg0, %c0_i32 : i32, i32
  }
  func.func @transform_1(%arg0: i32) -> (i32, i32) {
    %c0_i32 = arith.constant 0 : i32
    %c0_i32_0 = arith.constant 0 : i32
    %c0_i32_1 = arith.constant 0 : i32
    return %c0_i32, %c0_i32_0 : i32, i32
  }
  func.func @transform_2(%arg0: i32) -> (i32, i32) {
    %c0_i32 = arith.constant 0 : i32
    %c0_i32_0 = arith.constant 0 : i32
    %c0_i32_1 = arith.constant 0 : i32
    return %c0_i32, %c0_i32_0 : i32, i32
  }
  func.func @transform_3(%arg0: i32) -> (i32, i32) {
    %c0_i32 = arith.constant 0 : i32
    %c0_i32_0 = arith.constant 0 : i32
    %c0_i32_1 = arith.constant 0 : i32
    return %c0_i32, %c0_i32_0 : i32, i32
  }
  func.func @transform_4(%arg0: i32) -> (i32, i32) {
    %c0_i32 = arith.constant 0 : i32
    %c0_i32_0 = arith.constant 0 : i32
    %c0_i32_1 = arith.constant 0 : i32
    return %c0_i32, %c0_i32_0 : i32, i32
  }
  func.func @transform_5(%arg0: i32) -> (i32, i32) {
    %c0_i32 = arith.constant 0 : i32
    %c0_i32_0 = arith.constant 0 : i32
    return %arg0, %c0_i32 : i32, i32
  }
}

</mosaic_0001>

<bundles_post_ra>
// kernel: tpu_custom_call.1
= control target key start
LH: loop header
LB: loop body
LE: loop exit
PB: predicated region body
PF: predicated region fallthrough
CT: control target
= control target key end

     0   :  { %10 = vsyncpa [#allocation3], 0  ;;  %s1358_s0 = inlined_call_operand.hbm [shape: bf16[16,1024], index: 0, kind: input, shape index: {}]   ;;  %s1359_s1 = inlined_call_operand.hbm [shape: bf16[1024,128], index: 1, kind: input, shape index: {}]   ;;  %s1360_s2 = inlined_call_operand.vmem [shape: f32[1,128], index: 2, kind: input, shape index: {}]   ;;  %s1361_s3 = inlined_call_operand.hbm [shape: bf16[128,128], index: 3, kind: input, shape index: {}]   ;;  %s1362_s4 = inlined_call_operand.vmem [shape: f32[1,128], index: 4, kind: input, shape index: {}]   ;;  %s1363_s5 = inlined_call_operand.hbm [shape: f32[16,128], index: 5, kind: output, shape index: {}]  }
   0x1   :  { %11 = vsyncpa [#allocation6], 0 }
   0x2   :  { %12 = vsyncpa [#allocation4], 0  ;;  %s1298_s18 = smov [#allocation5]  }
   0x3   :  { %s30_s19 = sshll.u32 %s1298_s18, 4  ;;  %s31_s19 = int_to_ptr.vmem [resolvable:$true] %s30_s19 }
   0x4   :  { %s1220_s20 = scalar_lea.vmem %s31_s19, 8192  ;;  %p1225_p1 = scmp.lt.s32.totalorder %s31_s19, %s31_s19 }
   0x5   :  { %p1221_p0 = scmp.ne.s32.totalorder %s31_s19, %s1220_s20  ;;  %p1226_p2 = scmp.lt.s32.totalorder %s1220_s20, %s1220_s20 }
   0x7   :  { %p1227_p3 = por %p1226_p2, %p1225_p1 }
   0x9   :  { %p1228_p4 = pnand %p1227_p3, %p1221_p0 }
   0xb   :  { %1231 = shalt.err (!%p1228_p4)
}
   0xc   :  { %s1299_s21 = smov 64   ;;  %s1300_s22 = smov 4  }
   0xd   :  { %36 = dma.hbm_to_vmem [thread:$0]  %s1359_s1, 8192, %s31_s19, [#allocation6], %s1299_s21, %s1299_s21, %s1300_s22  }
   0xe   :  { %s1301_s25 = smov [#allocation2]  }
   0xf   :  { %s18_s26 = sshll.u32 %s1301_s25, 4  ;;  %s19_s26 = int_to_ptr.vmem [resolvable:$true] %s18_s26 }
  0x10   :  { %s1240_s27 = scalar_lea.vmem %s19_s26, 1024  ;;  %p1245_p6 = scmp.lt.s32.totalorder %s19_s26, %s19_s26 }
  0x11   :  { %p1241_p5 = scmp.ne.s32.totalorder %s19_s26, %s1240_s27  ;;  %p1246_p7 = scmp.lt.s32.totalorder %s1240_s27, %s1240_s27 }
  0x13   :  { %p1247_p8 = por %p1246_p7, %p1245_p6 }
  0x15   :  { %p1248_p9 = pnand %p1247_p8, %p1241_p5 }
  0x17   :  { %1251 = shalt.err (!%p1248_p9)
}
  0x18   :  { %s1302_s28 = smov 512   ;;  %s1303_s29 = smov 32  }
  0x19   :  { %24 = dma.hbm_to_vmem [thread:$0]  %s1358_s0, 1024, %s19_s26, [#allocation3], %s1302_s28, %s1302_s28, %s1303_s29  }
  0x1a   :  { %s1304_s7 = smov [#allocation7]  }
  0x1b   :  { %s44_s8 = sshll.u32 %s1304_s7, 4  ;;  %s45_s8 = int_to_ptr.vmem [resolvable:$true] %s44_s8 }
  0x1c   :  { %s1260_s1 = scalar_lea.vmem %s45_s8, 1024  ;;  %p1265_p11 = scmp.lt.s32.totalorder %s45_s8, %s45_s8 }
  0x1d   :  { %p1261_p10 = scmp.ne.s32.totalorder %s45_s8, %s1260_s1  ;;  %p1266_p12 = scmp.lt.s32.totalorder %s1260_s1, %s1260_s1 }
  0x1f   :  { %p1267_p13 = por %p1266_p12, %p1265_p11 }
  0x21   :  { %p1268_p0 = pnand %p1267_p13, %p1261_p10 }
  0x23   :  { %1271 = shalt.err (!%p1268_p0)
}
  0x24   :  { %50 = dma.hbm_to_vmem [thread:$0]  %s1361_s3, 1024, %s45_s8, [#allocation6], %s1299_s21, %s1299_s21, %s1300_s22  }
  0x25   :  { %1292 = dma.done.wait [#allocation3], 1024  }
  0x26   :  { %1293 = vsyncadd [#allocation3], 4294966272 }
  0x27   :  { %1294 = dma.done.wait [#allocation6], 9216  }
  0x28   :  { %1295 = vsyncadd [#allocation6], 4294958080  ;;  %v1140_v0 = vld [vmem:[#allocation5 + $0x78] sm:$0xff]   ;;  %v1144_v4 = vld [vmem:[#allocation5 + $0x70] sm:$0xff]   ;;  %vm1306_vm0 = vmmov 0   ;;  %s1307_s12 = smov [#allocation8]  }
  0x29   :  { %v1141_v1 = vld [vmem:[#allocation5 + $0xf8] sm:$0xff]   ;;  %1011 = vmatprep.subr.bf16.mxu0 %v1140_v0  ;;  %v1145_v5 = vld [vmem:[#allocation5 + $0xf0] sm:$0xff]   ;;  %v1148_v8 = vld [vmem:[#allocation5 + $0x68] sm:$0xff]   ;;  %s916_s13 = sshll.u32 %s1307_s12, 4  ;;  %s917_s13 = int_to_ptr.vmem [resolvable:$true] %s916_s13 }
  0x2a   :  { %v1142_v2 = vld [vmem:[#allocation5 + $0x38] sm:$0xff]   ;;  %1033 = vmatprep.subr.bf16.mxu1 %v1141_v1  ;;  %v1146_v6 = vld [vmem:[#allocation5 + $0x30] sm:$0xff]   ;;  %v1149_v9 = vld [vmem:[#allocation5 + $0xe8] sm:$0xff]   ;;  %s1272_s14 = scalar_lea.vmem %s917_s13, 256  ;;  %p1277_p2 = scmp.lt.s32.totalorder %s917_s13, %s917_s13 }
  0x2b   :  { %v1143_v3 = vld [vmem:[#allocation5 + $0xb8] sm:$0xff]   ;;  %1012 = vmatpush3.bf16.msra.mxu0 %v1142_v2  ;;  %v1147_v7 = vld [vmem:[#allocation5 + $0xb0] sm:$0xff]   ;;  %v1150_v10 = vld [vmem:[#allocation5 + $0x28] sm:$0xff]   ;;  %p1273_p1 = scmp.ne.s32.totalorder %s917_s13, %s1272_s14  ;;  %p1278_p3 = scmp.lt.s32.totalorder %s1272_s14, %s1272_s14 }
  0x2c   :  { %1034 = vmatpush3.bf16.msra.mxu1 %v1143_v3  ;;  %1013 = vmatprep.subr.bf16.mxu0 %v1144_v4  ;;  %v1151_v11 = vld [vmem:[#allocation5 + $0xa8] sm:$0xff]   ;;  %v1152_v12 = vld [vmem:[#allocation5 + $0x60] sm:$0xff]   ;;  %v1156_v16 = vld [vmem:[#allocation5 + $0x58] sm:$0xff]  }
  0x2d   :  { %1035 = vmatprep.subr.bf16.mxu1 %v1145_v5  ;;  %v1153_v13 = vld [vmem:[#allocation5 + $0xe0] sm:$0xff]   ;;  %v1157_v17 = vld [vmem:[#allocation5 + $0xd8] sm:$0xff]   ;;  %v1160_v20 = vld [vmem:[#allocation5 + $0x50] sm:$0xff]   ;;  %p1279_p4 = por %p1278_p3, %p1277_p2 }
  0x2e   :  { %v1154_v14 = vld [vmem:[#allocation5 + $0x20] sm:$0xff]   ;;  %v1158_v18 = vld [vmem:[#allocation5 + $0x18] sm:$0xff]   ;;  %v1161_v21 = vld [vmem:[#allocation5 + $0xd0] sm:$0xff]  }
  0x2f   :  { %1014 = vmatpush3.bf16.msra.mxu0 %v1146_v6  ;;  %v1155_v15 = vld [vmem:[#allocation5 + $0xa0] sm:$0xff]   ;;  %v1159_v19 = vld [vmem:[#allocation5 + $0x98] sm:$0xff]   ;;  %v1162_v22 = vld [vmem:[#allocation5 + $0x10] sm:$0xff]   ;;  %p1280_p5 = pnand %p1279_p4, %p1273_p1 }
  0x30   :  { %1036 = vmatpush3.bf16.msra.mxu1 %v1147_v7  ;;  %1015 = vmatprep.subr.bf16.mxu0 %v1148_v8  ;;  %v1163_v23 = vld [vmem:[#allocation5 + $0x90] sm:$0xff]   ;;  %v1164_v24 = vld [vmem:[#allocation5 + $0x48] sm:$0xff]   ;;  %v1168_v28 = vld [vmem:[#allocation5 + $0x40] sm:$0xff]  }
  0x31   :  { %1037 = vmatprep.subr.bf16.mxu1 %v1149_v9  ;;  %v1165_v25 = vld [vmem:[#allocation5 + $0xc8] sm:$0xff]   ;;  %v1169_v29 = vld [vmem:[#allocation5 + $0xc0] sm:$0xff]   ;;  %v1172_v40 = vld [vmem:[#allocation5 + $0x178] sm:$0xff]  }
  0x32   :  { %v1166_v26 = vld [vmem:[#allocation5 + $0x8] sm:$0xff]   ;;  %v1170_v30 = vld [vmem:[#allocation5] sm:$0xff]   ;;  %v1173_v41 = vld [vmem:[#allocation5 + $0x1f8] sm:$0xff]  }
  0x33   :  { %1016 = vmatpush3.bf16.msra.mxu0 %v1150_v10  ;;  %v1167_v27 = vld [vmem:[#allocation5 + $0x88] sm:$0xff]   ;;  %v1171_v31 = vld [vmem:[#allocation5 + $0x80] sm:$0xff]   ;;  %v1174_v42 = vld [vmem:[#allocation5 + $0x138] sm:$0xff]  }
  0x34   :  { %1038 = vmatpush3.bf16.msra.mxu1 %v1151_v11  ;;  %1017 = vmatprep.subr.bf16.mxu0 %v1152_v12  ;;  %v63_v32 = vld [vmem:[#allocation2] sm:$0xff]  ;;  %v64_v34 = vld [vmem:[#allocation2 + $0x8] sm:$0xff]  ;;  %v1175_v43 = vld [vmem:[#allocation5 + $0x1b8] sm:$0xff]  }
  0x35   :  { %1039 = vmatprep.subr.bf16.mxu1 %v1153_v13  ;;  %v67_v33 = vld [vmem:[#allocation2 + $0x20] sm:$0xff]  ;;  %v68_v37 = vld [vmem:[#allocation2 + $0x28] sm:$0xff]  ;;  %v1176_v44 = vld [vmem:[#allocation5 + $0x170] sm:$0xff]  }
  0x36   :  { %v930_v35 = vcombine.low %v63_v32, %v67_v33  ;;  %v931_v36 = vcombine.high %v63_v32, %v67_v33  ;;  %v932_v38 = vcombine.low %v64_v34, %v68_v37  ;;  %v933_v39 = vcombine.high %v64_v34, %v68_v37  ;;  %v1177_v45 = vld [vmem:[#allocation5 + $0x1f0] sm:$0xff]   ;;  %v1180_v48 = vld [vmem:[#allocation5 + $0x168] sm:$0xff]   ;;  %v1184_v52 = vld [vmem:[#allocation5 + $0x160] sm:$0xff]  }
  0x37   :  { %1018 = vmatpush3.bf16.msra.mxu0 %v1154_v14  ;;  %v1178_v46 = vld [vmem:[#allocation5 + $0x130] sm:$0xff]   ;;  %v1181_v49 = vld [vmem:[#allocation5 + $0x1e8] sm:$0xff]   ;;  %v1185_v53 = vld [vmem:[#allocation5 + $0x1e0] sm:$0xff]  }
  0x38   :  { %1040 = vmatpush3.bf16.msra.mxu1 %v1155_v15  ;;  %1019 = vmatprep.subr.bf16.mxu0 %v1156_v16  ;;  %v1179_v47 = vld [vmem:[#allocation5 + $0x1b0] sm:$0xff]   ;;  %v1182_v50 = vld [vmem:[#allocation5 + $0x128] sm:$0xff]   ;;  %v1186_v54 = vld [vmem:[#allocation5 + $0x120] sm:$0xff]  }
  0x39   :  { %1041 = vmatprep.subr.bf16.mxu1 %v1157_v17  ;;  %662 = vmatprep.mubr.bf16.mxu0 %v931_v36  ;;  %v1183_v51 = vld [vmem:[#allocation5 + $0x1a8] sm:$0xff]   ;;  %v1187_v55 = vld [vmem:[#allocation5 + $0x1a0] sm:$0xff]   ;;  %v1188_v56 = vld [vmem:[#allocation5 + $0x158] sm:$0xff]   ;;  %v1305_v17 = vmov 0.0  }
  0x3a   :  { %703 = vmatprep.mubr.bf16.mxu1 %v933_v39  ;;  %v1189_v57 = vld [vmem:[#allocation5 + $0x1d8] sm:$0xff]   ;;  %v1192_v60 = vld [vmem:[#allocation5 + $0x150] sm:$0xff]   ;;  %v1196_v0 = vld [vmem:[#allocation5 + $0x148] sm:$0xff]  }
  0x3b   :  { %1020 = vmatpush3.bf16.msra.mxu0 %v1158_v18  ;;  %v1190_v58 = vld [vmem:[#allocation5 + $0x118] sm:$0xff]   ;;  %v1193_v61 = vld [vmem:[#allocation5 + $0x1d0] sm:$0xff]   ;;  %v1197_v1 = vld [vmem:[#allocation5 + $0x1c8] sm:$0xff]  }
  0x3c   :  { %1042 = vmatpush3.bf16.msra.mxu1 %v1159_v19  ;;  %1021 = vmatprep.subr.bf16.mxu0 %v1160_v20  ;;  %v1191_v59 = vld [vmem:[#allocation5 + $0x198] sm:$0xff]   ;;  %v1194_v62 = vld [vmem:[#allocation5 + $0x110] sm:$0xff]   ;;  %v1198_v2 = vld [vmem:[#allocation5 + $0x108] sm:$0xff]  }
  0x3d   :  { %1043 = vmatprep.subr.bf16.mxu1 %v1161_v21  ;;  %v1195_v63 = vld [vmem:[#allocation5 + $0x190] sm:$0xff]   ;;  %v1199_v3 = vld [vmem:[#allocation5 + $0x188] sm:$0xff]   ;;  %v1200_v4 = vld [vmem:[#allocation5 + $0x140] sm:$0xff]  }
  0x3e   :  { %v1201_v5 = vld [vmem:[#allocation5 + $0x1c0] sm:$0xff]   ;;  %v65_v8 = vld [vmem:[#allocation2 + $0x10] sm:$0xff]  ;;  %v66_v12 = vld [vmem:[#allocation2 + $0x18] sm:$0xff] }
  0x3f   :  { %1022 = vmatpush3.bf16.msra.mxu0 %v1162_v22  ;;  %v1202_v6 = vld [vmem:[#allocation5 + $0x100] sm:$0xff]   ;;  %v69_v9 = vld [vmem:[#allocation2 + $0x30] sm:$0xff]  ;;  %v70_v13 = vld [vmem:[#allocation2 + $0x38] sm:$0xff] }
  0x40   :  { %1044 = vmatpush3.bf16.msra.mxu1 %v1163_v23  ;;  %1023 = vmatprep.subr.bf16.mxu0 %v1164_v24  ;;  %v1203_v7 = vld [vmem:[#allocation5 + $0x180] sm:$0xff]   ;;  %v934_v10 = vcombine.low %v65_v8, %v69_v9  ;;  %v935_v11 = vcombine.high %v65_v8, %v69_v9  ;;  %v936_v14 = vcombine.low %v66_v12, %v70_v13  ;;  %v1204_v16 = vld [vmem:[#allocation7 + $0x38] sm:$0xff]   ;;  %v1205_v18 = vld [vmem:[#allocation7 + $0x30] sm:$0xff]  }
  0x41   :  { %1045 = vmatprep.subr.bf16.mxu1 %v1165_v25  ;;  %v937_v15 = vcombine.high %v66_v12, %v70_v13  ;;  %v1206_v19 = vld [vmem:[#allocation7 + $0x28] sm:$0xff]   ;;  %v1207_v20 = vld [vmem:[#allocation7 + $0x20] sm:$0xff]   ;;  %v1208_v21 = vld [vmem:[#allocation7 + $0x18] sm:$0xff]  }
  0x42   :  { %v1209_v22 = vld [vmem:[#allocation7 + $0x10] sm:$0xff]   ;;  %v1210_v23 = vld [vmem:[#allocation7 + $0x8] sm:$0xff]   ;;  %v1211_v24 = vld [vmem:[#allocation7] sm:$0xff]  }
  0x43   :  { %1024 = vmatpush3.bf16.msra.mxu0 %v1166_v26  ;;  %v929_v32 = vld [vmem:[%s1360_s2] ss:$0 sm:$0xff] }
  0x44   :  { %1046 = vmatpush3.bf16.msra.mxu1 %v1167_v27  ;;  %1025 = vmatprep.subr.bf16.mxu0 %v1168_v28 }
  0x45   :  { %1047 = vmatprep.subr.bf16.mxu1 %v1169_v29 }
  0x47   :  { %1026 = vmatpush3.bf16.msra.mxu0 %v1170_v30 }
  0x48   :  { %1048 = vmatpush3.bf16.msra.mxu1 %v1171_v31  ;;  %1055 = vmatprep.subr.bf16.mxu0 %v1172_v40 }
  0x49   :  { %1077 = vmatprep.subr.bf16.mxu1 %v1173_v41 }
  0x4a   :  { %663 = vmatmul.mubr.bf16.vlgmr.msra.gmra.mxu0 %v930_v35 }
  0x4b   :  { %704 = vmatmul.mubr.bf16.vlgmr.msra.gmra.mxu1 %v932_v38  ;;  %1056 = vmatpush3.bf16.msra.mxu0 %v1174_v42 }
  0x4c   :  { %1078 = vmatpush3.bf16.msra.mxu1 %v1175_v43  ;;  %1057 = vmatprep.subr.bf16.mxu0 %v1176_v44 }
  0x4d   :  { %1079 = vmatprep.subr.bf16.mxu1 %v1177_v45  ;;  %744 = vmatprep.mubr.bf16.mxu0 %v935_v11 }
  0x4e   :  { %785 = vmatprep.mubr.bf16.mxu1 %v937_v15 }
  0x4f   :  { %1058 = vmatpush3.bf16.msra.mxu0 %v1178_v46 }
  0x50   :  { %1080 = vmatpush3.bf16.msra.mxu1 %v1179_v47  ;;  %1059 = vmatprep.subr.bf16.mxu0 %v1180_v48 }
  0x51   :  { %1081 = vmatprep.subr.bf16.mxu1 %v1181_v49 }
  0x53   :  { %1060 = vmatpush3.bf16.msra.mxu0 %v1182_v50 }
  0x54   :  { %1082 = vmatpush3.bf16.msra.mxu1 %v1183_v51  ;;  %1061 = vmatprep.subr.bf16.mxu0 %v1184_v52 }
  0x55   :  { %1083 = vmatprep.subr.bf16.mxu1 %v1185_v53 }
  0x57   :  { %1062 = vmatpush3.bf16.msra.mxu0 %v1186_v54 }
  0x58   :  { %1084 = vmatpush3.bf16.msra.mxu1 %v1187_v55  ;;  %1063 = vmatprep.subr.bf16.mxu0 %v1188_v56 }
  0x59   :  { %1085 = vmatprep.subr.bf16.mxu1 %v1189_v57 }
  0x5b   :  { %1064 = vmatpush3.bf16.msra.mxu0 %v1190_v58 }
  0x5c   :  { %1086 = vmatpush3.bf16.msra.mxu1 %v1191_v59  ;;  %1065 = vmatprep.subr.bf16.mxu0 %v1192_v60 }
  0x5d   :  { %1087 = vmatprep.subr.bf16.mxu1 %v1193_v61  ;;  %v1002_v61 = vld [vmem:[%s1362_s4] ss:$0 sm:$0xff] }
  0x5f   :  { %1066 = vmatpush3.bf16.msra.mxu0 %v1194_v62 }
  0x60   :  { %1088 = vmatpush3.bf16.msra.mxu1 %v1195_v63  ;;  %1067 = vmatprep.subr.bf16.mxu0 %v1196_v0 }
  0x61   :  { %1089 = vmatprep.subr.bf16.mxu1 %v1197_v1 }
  0x63   :  { %1068 = vmatpush3.bf16.msra.mxu0 %v1198_v2 }
  0x64   :  { %1090 = vmatpush3.bf16.msra.mxu1 %v1199_v3  ;;  %1069 = vmatprep.subr.bf16.mxu0 %v1200_v4 }
  0x65   :  { %1091 = vmatprep.subr.bf16.mxu1 %v1201_v5 }
  0x67   :  { %1070 = vmatpush3.bf16.msra.mxu0 %v1202_v6 }
  0x68   :  { %1092 = vmatpush3.bf16.msra.mxu1 %v1203_v7  ;;  %1108 = vmatprep.subr.bf16.mxu0 %v1305_v17 }
  0x6a   :  { %745 = vmatmul.mubr.bf16.vlgmr.msra.gmra.mxu0 %v934_v10 }
  0x6b   :  { %786 = vmatmul.mubr.bf16.vlgmr.msra.gmra.mxu1 %v936_v14  ;;  %1109 = vmatpush3.bf16.msra.mxu0 %v1204_v16 }
  0x6c   :  { %1110 = vmatprep.subr.bf16.mxu0 %v1305_v17  ;;  %1124 = vmatprep.mubr.msk.bf16.mxu0 %vm1306_vm0, %v1305_v17 }
  0x6f   :  { %1111 = vmatpush3.bf16.msra.mxu0 %v1205_v18 }
  0x70   :  { %1112 = vmatprep.subr.bf16.mxu0 %v1305_v17 }
  0x73   :  { %1113 = vmatpush3.bf16.msra.mxu0 %v1206_v19 }
  0x74   :  { %1114 = vmatprep.subr.bf16.mxu0 %v1305_v17 }
  0x77   :  { %1115 = vmatpush3.bf16.msra.mxu0 %v1207_v20 }
  0x78   :  { %1116 = vmatprep.subr.bf16.mxu0 %v1305_v17 }
  0x7b   :  { %1117 = vmatpush3.bf16.msra.mxu0 %v1208_v21 }
  0x7c   :  { %1118 = vmatprep.subr.bf16.mxu0 %v1305_v17 }
  0x7f   :  { %1119 = vmatpush3.bf16.msra.mxu0 %v1209_v22 }
  0x80   :  { %1120 = vmatprep.subr.bf16.mxu0 %v1305_v17 }
  0x83   :  { %1121 = vmatpush3.bf16.msra.mxu0 %v1210_v23 }
  0x84   :  { %1122 = vmatprep.subr.bf16.mxu0 %v1305_v17 }
  0x87   :  { %1123 = vmatpush3.bf16.msra.mxu0 %v1211_v24 }
 0x10a   :  { %v1027_v25 = vpop.f32.mrf.mxu0 }
 0x10b   :  { %v1049_v26 = vpop.f32.mrf.mxu1 }
 0x10c   :  { %v1028_v27 = vpop.f32.mrf.mxu0 }
 0x10d   :  { %v1050_v28 = vpop.f32.mrf.mxu1  ;;  %v1029_v30 = vadd.f32 %v1028_v27, %v1027_v25 }
 0x10e   :  { %v1030_v29 = vpop.f32.mrf.mxu0  ;;  %v1051_v35 = vadd.f32 %v1050_v28, %v1049_v26 }
 0x10f   :  { %v1052_v31 = vpop.f32.mrf.mxu1  ;;  %v665_v34 = vadd.f32 %v1029_v30, %v929_v32 }
 0x110   :  { %v1031_v33 = vpop.f32.mrf.mxu0 }
 0x111   :  { %v1032_v36 = vadd.f32 %v1031_v33, %v1030_v29  ;;  %v1053_v37 = vpop.f32.mrf.mxu1  ;;  %v706_v41 = vadd.f32 %v1051_v35, %v665_v34 }
 0x112   :  { %v1054_v46 = vadd.f32 %v1053_v37, %v1052_v31 }
 0x113   :  { %v668_v42 = vadd.f32 %v1032_v36, %v929_v32 }
 0x115   :  { %v709_v50 = vadd.f32 %v1054_v46, %v668_v42 }
 0x12a   :  { %v1071_v38 = vpop.f32.mrf.mxu0 }
 0x12b   :  { %v1093_v39 = vpop.f32.mrf.mxu1 }
 0x12c   :  { %v1072_v40 = vpop.f32.mrf.mxu0 }
 0x12d   :  { %v1073_v43 = vadd.f32 %v1072_v40, %v1071_v38  ;;  %v1094_v44 = vpop.f32.mrf.mxu1 }
 0x12e   :  { %v1074_v45 = vpop.f32.mrf.mxu0  ;;  %v1095_v51 = vadd.f32 %v1094_v44, %v1093_v39 }
 0x12f   :  { %v747_v47 = vadd.f32 %v1073_v43, %v706_v41  ;;  %v1096_v48 = vpop.f32.mrf.mxu1 }
 0x130   :  { %v1075_v49 = vpop.f32.mrf.mxu0 }
 0x131   :  { %v1076_v52 = vadd.f32 %v1075_v49, %v1074_v45  ;;  %v1097_v53 = vpop.f32.mrf.mxu1  ;;  %v788_v54 = vadd.f32 %v1095_v51, %v747_v47 }
 0x132   :  { %v1098_v56 = vadd.f32 %v1097_v53, %v1096_v48 }
 0x133   :  { %v750_v55 = vadd.f32 %v1076_v52, %v709_v50  ;;  %v794_v58 = vmax.f32 %v788_v54, 0.0 }
 0x135   :  { %v791_v57 = vadd.f32 %v1098_v56, %v750_v55 }
 0x137   :  { %v795_v59 = vmax.f32 %v791_v57, 0.0 }
 0x139   :  { %v796_v60 = vpack.c.bf16 %v795_v59, %v794_v58 }
 0x13b   :  { %1125 = vmatmul.mubr.bf16.vlgmr.msra.gmra.mxu0 %v796_v60 }
 0x1fb   :  { %v902_v62 = vpop.f32.mrf.mxu0 }
 0x1fc   :  { %v903_v63 = vadd.f32 %v1002_v61, %v902_v62 }
 0x1fd   :  { %v1126_v0 = vpop.f32.mrf.mxu0 }
 0x1fe   :  { %909 = vst [vmem:[#allocation8] sm:$0xff] %v903_v63 }
 0x1ff   :  { %v905_v1 = vpop.f32.mrf.mxu0 }
 0x200   :  { %v906_v2 = vadd.f32 %v1002_v61, %v905_v1 }
 0x201   :  { %v1127_v3 = vpop.f32.mrf.mxu0 }
 0x202   :  { %910 = vst [vmem:[#allocation8 + $0x8] sm:$0xff] %v906_v2 }
 0x203   :  { %1283 = shalt.err (!%p1280_p5)
}
 0x204   :  { %s1308_s15 = smov 128   ;;  %s1309_s4 = smov 8  }
 0x205   :  { %922 = dma.vmem_to_hbm [thread:$0]  %s917_s13, 256, %s1363_s5, [#allocation4], %s1308_s15, %s1308_s15, %s1309_s4  }
 0x206   :  { %1296 = dma.done.wait [#allocation4], 256  }
 0x207   :  { %1297 = vsyncadd [#allocation4], 4294967040 }
 0x208   :  { %926 = vsyncpa [#allocation3], 1 }
 0x209   :  { %927 = vsyncpa [#allocation6], 1 }
 0x20a   :  { %928 = vsyncpa [#allocation4], 1 }

</bundles_post_ra>
